<compile_context>
chip_gen: v7x
topology: tpu7x:2x2x1
jax: 0.10.0
libtpu: 0.0.40
codegen_flags: <defaults>
</compile_context>

<pallas_src>
import jax
import jax.numpy as jnp
from jax.experimental import pallas as pl
from jax.experimental.pallas import tpu as pltpu

D_IN, D_HID, D_OUT = 20, 256, 10
TB_MAX = 2048        # max batch-tile rows per grid step (multiple of 16 for bf16)


def _round_up(n, m):
    return (n + m - 1) // m * m


def _choose_batch_tile(B):
    """Sublane-aligned (16) batch tile, balanced across grid steps.

    Ensures >= 2 grid steps whenever B > 16 so v7x's two TensorCores both get
    work; on v5e/v6e extra steps are harmless (per-step overhead ~0.35 us).
    """
    if B <= 16:
        return 16
    n_steps = max(2, -(-B // TB_MAX))            # ceil(B / TB_MAX), at least 2
    return _round_up(-(-B // n_steps), 16)        # round_up(ceil(B/n_steps), 16)


def mlp_kernel(x_ref, w1_ref, b1_ref, w2_ref, b2_ref, o_ref):
    # Hidden layer: bf16 MXU matmul, f32 accumulation; bias + ReLU in f32 (VPU).
    h = jnp.dot(x_ref[...], w1_ref[...], preferred_element_type=jnp.float32)
    h = jnp.maximum(h + b1_ref[...], 0.0)
    # Output layer: bf16 activations into the MXU, f32 accumulate, f32 bias.
    y = jnp.dot(h.astype(w2_ref.dtype), w2_ref[...],
                preferred_element_type=jnp.float32) + b2_ref[...]
    o_ref[...] = y.astype(o_ref.dtype)


@jax.jit
def mlp_forward(x, w1, b1, w2, b2):
    """x: (B, 20) f32.  w1: (20, 256), w2: (256, 10) in (in, out) layout.
    b1: (256,)/(1,256), b2: (10,)/(1,10).  Returns (B, 10) f32."""
    B = x.shape[0]

    # --- layout / dtype prep (fused by jit into the surrounding graph) -------
    tb = _choose_batch_tile(B)
    b_pad = _round_up(B, tb)                      # grid covers b_pad rows exactly

    x_p = jnp.zeros((b_pad, D_IN), jnp.bfloat16).at[:B, :].set(
        x.astype(jnp.bfloat16))
    w1_b = w1.astype(jnp.bfloat16)
    w2_b = w2.astype(jnp.bfloat16)
    b1_r = jnp.asarray(b1, jnp.float32).reshape(1, D_HID)
    b2_r = jnp.asarray(b2, jnp.float32).reshape(1, D_OUT)

    cost = pl.CostEstimate(
        flops=2 * b_pad * (D_IN * D_HID + D_HID * D_OUT),
        transcendentals=0,
        bytes_accessed=(b_pad * (D_IN * 2 + D_OUT * 4)            # x in, y out
                        + (D_IN * D_HID + D_HID * D_OUT) * 2      # bf16 weights
                        + (D_HID + D_OUT) * 4),                   # f32 biases
    )

    out_padded = pl.pallas_call(
        mlp_kernel,
        out_shape=jax.ShapeDtypeStruct((b_pad, D_OUT), jnp.float32),
        grid_spec=pltpu.PrefetchScalarGridSpec(
            num_scalar_prefetch=0,
            grid=(b_pad // tb,),
            in_specs=[
                pl.BlockSpec((tb, D_IN), lambda i: (i, 0)),        # streamed x tile
                pl.BlockSpec((D_IN, D_HID), lambda i: (0, 0)),     # resident weights
                pl.BlockSpec((1, D_HID), lambda i: (0, 0)),
                pl.BlockSpec((D_HID, D_OUT), lambda i: (0, 0)),
                pl.BlockSpec((1, D_OUT), lambda i: (0, 0)),
            ],
            out_specs=pl.BlockSpec((tb, D_OUT), lambda i: (i, 0)),  # unpadded store
        ),
        compiler_params=pltpu.CompilerParams(
            dimension_semantics=("parallel",),  # batch tiles shard across v7x's 2 TCs
        ),
        cost_estimate=cost,
    )(x_p, w1_b, b1_r, w2_b, b2_r)

    return out_padded[:B, :]


def _reference(x, w1, b1, w2, b2):
    # Matches the kernel's numerics: bf16 MXU inputs, f32 accumulate, f32 bias/ReLU.
    xb = x.astype(jnp.bfloat16).astype(jnp.float32)
    w1b = w1.astype(jnp.bfloat16).astype(jnp.float32)
    w2b = w2.astype(jnp.bfloat16).astype(jnp.float32)
    h = jnp.maximum(xb @ w1b + b1.reshape(1, -1), 0.0)
    hb = h.astype(jnp.bfloat16).astype(jnp.float32)
    return hb @ w2b + b2.reshape(1, -1)


if __name__ == "__main__":
    key = jax.random.PRNGKey(0)
    k_x, k_w1, k_b1, k_w2, k_b2, k_x2 = jax.random.split(key, 6)

    B = 2
    # Deterministic params mimicking nn.Linear's U(-1/sqrt(fan_in), +1/sqrt(fan_in)),
    # stored in (in, out) layout (PyTorch stores (out, in); pre-transposed here).
    x = jax.random.normal(k_x, (B, D_IN), dtype=jnp.float32)
    lim1 = 1.0 / (D_IN ** 0.5)
    w1 = jax.random.uniform(k_w1, (D_IN, D_HID), jnp.float32, -lim1, lim1)
    b1 = jax.random.uniform(k_b1, (D_HID,), jnp.float32, -lim1, lim1)
    lim2 = 1.0 / (D_HID ** 0.5)
    w2 = jax.random.uniform(k_w2, (D_HID, D_OUT), jnp.float32, -lim2, lim2)
    b2 = jax.random.uniform(k_b2, (D_OUT,), jnp.float32, -lim2, lim2)

    out = mlp_forward(x, w1, b1, w2, b2)
    jax.block_until_ready(out)
    ref = _reference(x, w1, b1, w2, b2)
    assert out.shape == (B, D_OUT)
    assert jnp.allclose(out, ref, atol=1e-3, rtol=1e-3)

    # Second check: non-aligned batch > 16 exercises the padding path and the
    # multi-step (>= 2) grid used for v7x megacore sharding.
    B2 = 40
    x2 = jax.random.normal(k_x2, (B2, D_IN), dtype=jnp.float32)
    out2 = mlp_forward(x2, w1, b1, w2, b2)
    jax.block_until_ready(out2)
    ref2 = _reference(x2, w1, b1, w2, b2)
    assert out2.shape == (B2, D_OUT)
    assert jnp.allclose(out2, ref2, atol=1e-3, rtol=1e-3)

    print("KERNEL_OK")
</pallas_src>

<mosaic_0001>
module attributes {stable_mosaic.version = 11 : i64} {
  func.func @mlp_kernel(%arg0: i32, %arg1: memref<16x20xbf16, #tpu.memory_space<vmem>>, %arg2: memref<20x256xbf16, #tpu.memory_space<vmem>>, %arg3: memref<1x256xf32, #tpu.memory_space<vmem>>, %arg4: memref<256x10xbf16, #tpu.memory_space<vmem>>, %arg5: memref<1x10xf32, #tpu.memory_space<vmem>>, %arg6: memref<16x10xf32, #tpu.memory_space<vmem>>) attributes {dimension_semantics = [#tpu.dimension_semantics<parallel>], iteration_bounds = array<i64: 1>, scalar_prefetch = 0 : i64, scratch_operands = 0 : i64, tpu.core_type = #tpu.core_type<tc>, window_params = [{transform_indices = @transform_0, window_bounds = array<i64: 16, 20>}, {pipeline_mode = #tpu.pipeline_mode<synchronous>, transform_indices = @transform_1, window_bounds = array<i64: 20, 256>}, {pipeline_mode = #tpu.pipeline_mode<synchronous>, transform_indices = @transform_2, window_bounds = array<i64: 1, 256>}, {pipeline_mode = #tpu.pipeline_mode<synchronous>, transform_indices = @transform_3, window_bounds = array<i64: 256, 10>}, {pipeline_mode = #tpu.pipeline_mode<synchronous>, transform_indices = @transform_4, window_bounds = array<i64: 1, 10>}, {transform_indices = @transform_5, window_bounds = array<i64: 16, 10>}]} {
    %c0 = arith.constant 0 : index
    %c0_0 = arith.constant 0 : index
    %0 = vector.load %arg1[%c0, %c0_0] : memref<16x20xbf16, #tpu.memory_space<vmem>>, vector<16x20xbf16>
    %c0_1 = arith.constant 0 : index
    %c0_2 = arith.constant 0 : index
    %1 = vector.load %arg2[%c0_1, %c0_2] : memref<20x256xbf16, #tpu.memory_space<vmem>>, vector<20x256xbf16>
    %cst = arith.constant dense<0.000000e+00> : vector<16x256xf32>
    %2 = tpu.matmul %0, %1, %cst {dimension_numbers = #tpu.dot_dimension_numbers<[1], [0], [0], [1], [0, 0, 1, 1], [], []>} : vector<16x20xbf16>, vector<20x256xbf16>, vector<16x256xf32> -> vector<16x256xf32>
    %c0_3 = arith.constant 0 : index
    %c0_4 = arith.constant 0 : index
    %3 = vector.load %arg3[%c0_3, %c0_4] : memref<1x256xf32, #tpu.memory_space<vmem>>, vector<1x256xf32>
    %4 = vector.broadcast %3 : vector<1x256xf32> to vector<16x256xf32>
    %5 = arith.addf %2, %4 : vector<16x256xf32>
    %cst_5 = arith.constant 0.000000e+00 : f32
    %6 = vector.broadcast %cst_5 : f32 to vector<16x256xf32>
    %7 = arith.maximumf %5, %6 : vector<16x256xf32>
    %8 = arith.truncf %7 : vector<16x256xf32> to vector<16x256xbf16>
    %c0_6 = arith.constant 0 : index
    %c0_7 = arith.constant 0 : index
    %9 = vector.load %arg4[%c0_6, %c0_7] : memref<256x10xbf16, #tpu.memory_space<vmem>>, vector<256x10xbf16>
    %cst_8 = arith.constant dense<0.000000e+00> : vector<16x10xf32>
    %10 = tpu.matmul %8, %9, %cst_8 {dimension_numbers = #tpu.dot_dimension_numbers<[1], [0], [0], [1], [0, 0, 1, 1], [], []>} : vector<16x256xbf16>, vector<256x10xbf16>, vector<16x10xf32> -> vector<16x10xf32>
    %c0_9 = arith.constant 0 : index
    %c0_10 = arith.constant 0 : index
    %11 = vector.load %arg5[%c0_9, %c0_10] : memref<1x10xf32, #tpu.memory_space<vmem>>, vector<1x10xf32>
    %12 = vector.broadcast %11 : vector<1x10xf32> to vector<16x10xf32>
    %13 = arith.addf %10, %12 : vector<16x10xf32>
    %c0_11 = arith.constant 0 : index
    %c0_12 = arith.constant 0 : index
    %14 = vector.load %arg6[%c0_11, %c0_12] : memref<16x10xf32, #tpu.memory_space<vmem>>, vector<16x10xf32>
    tpu.vector_store %arg6[%c0_11, %c0_12], %13 {strides = array<i32>} : memref<16x10xf32, #tpu.memory_space<vmem>>, vector<16x10xf32>,
    return
  }
  func.func @transform_0(%arg0: i32) -> (i32, i32) {
    %c0_i32 = arith.constant 0 : i32
    %c0_i32_0 = arith.constant 0 : i32
    return %arg0, %c0_i32 : i32, i32
  }
  func.func @transform_1(%arg0: i32) -> (i32, i32) {
    %c0_i32 = arith.constant 0 : i32
    %c0_i32_0 = arith.constant 0 : i32
    %c0_i32_1 = arith.constant 0 : i32
    return %c0_i32, %c0_i32_0 : i32, i32
  }
  func.func @transform_2(%arg0: i32) -> (i32, i32) {
    %c0_i32 = arith.constant 0 : i32
    %c0_i32_0 = arith.constant 0 : i32
    %c0_i32_1 = arith.constant 0 : i32
    return %c0_i32, %c0_i32_0 : i32, i32
  }
  func.func @transform_3(%arg0: i32) -> (i32, i32) {
    %c0_i32 = arith.constant 0 : i32
    %c0_i32_0 = arith.constant 0 : i32
    %c0_i32_1 = arith.constant 0 : i32
    return %c0_i32, %c0_i32_0 : i32, i32
  }
  func.func @transform_4(%arg0: i32) -> (i32, i32) {
    %c0_i32 = arith.constant 0 : i32
    %c0_i32_0 = arith.constant 0 : i32
    %c0_i32_1 = arith.constant 0 : i32
    return %c0_i32, %c0_i32_0 : i32, i32
  }
  func.func @transform_5(%arg0: i32) -> (i32, i32) {
    %c0_i32 = arith.constant 0 : i32
    %c0_i32_0 = arith.constant 0 : i32
    return %arg0, %c0_i32 : i32, i32
  }
}

</mosaic_0001>

<bundles_post_ra>
// kernel: mlp_forward.1
= control target key start
LH: loop header
LB: loop body
LE: loop exit
PB: predicated region body
PF: predicated region fallthrough
CT: control target
= control target key end

     0   :  { %v370_v1 = vmov 0   ;;  %vm62_vm0 = vcmask 1041408   ;;  %vm58_vm1 = vcmask 162816   ;;  %v28_v24 = vlaneseq  ;;  %s473_s1 = inlined_call_operand.vmem [shape: bf16[20,256], index: 1, kind: input, shape index: {}]   ;;  %s474_s0 = inlined_call_operand.vmem [shape: bf16[16,20], index: 0, kind: input, shape index: {}]   ;;  %s475_s3 = inlined_call_operand.vmem [shape: bf16[256,10], index: 3, kind: input, shape index: {}]   ;;  %s476_s2 = inlined_call_operand.vmem [shape: f32[1,256], index: 2, kind: input, shape index: {}]   ;;  %s477_s4 = inlined_call_operand.vmem [shape: f32[1,10], index: 4, kind: input, shape index: {}]   ;;  %s478_s5 = inlined_call_operand.vmem [shape: f32[16,10], index: 5, kind: output, shape index: {}]  }
   0x1   :  { %v25_v0 = vld [vmem:[%s473_s1 + $0x10] sm:$0x33]  ;;  %101 = vmatprep.mubr.bf16.mxu0 %v370_v1  ;;  %v348_v2 = vld [vmem:[%s473_s1 + $0x4] ss:$8 sps:$4 sm:$0xff]   ;;  %v351_v4 = vld [vmem:[%s473_s1] ss:$8 sps:$4 sm:$0xff]  }
   0x2   :  { %v305_v3 = vcombine.high %v25_v0, %v25_v0  ;;  %v304_v5 = vcombine.low %v25_v0, %v25_v0  ;;  %69 = vmatprep.subr.bf16.mxu0 %v348_v2  ;;  %v354_v6 = vld [vmem:[%s475_s3 + $0x40] sm:$0xff]   ;;  %v356_v10 = vld [vmem:[%s475_s3 + $0x48] sm:$0xff]   ;;  %v358_v12 = vld [vmem:[%s475_s3 + $0x50] sm:$0xff]   ;;  %v29_v25 = vshrl.u32 %v28_v24, 7  ;;  %vm294_vm2 = vcmask 80896  }
   0x3   :  { %70 = vmatpush1.bf16.msra.mxu0 %v351_v4  ;;  %v355_v7 = vld [vmem:[%s475_s3] sm:$0xff]   ;;  %325 = vmatprep.subr.bf16.mxu1 %v354_v6  ;;  %v357_v11 = vld [vmem:[%s475_s3 + $0x8] sm:$0xff]   ;;  %v359_v13 = vld [vmem:[%s475_s3 + $0x10] sm:$0xff]  }
   0x4   :  { %306 = vmatprep.subr.msk.bf16.mxu0 %vm62_vm0, %v305_v3  ;;  %v64_v8 = vsel %vm62_vm0, %v304_v5, 0  ;;  %v353_v9 = vld [vmem:[%s474_s0] sm:$0xff]   ;;  %326 = vmatpush3.bf16.msra.mxu1 %v355_v7  ;;  %v360_v14 = vld [vmem:[%s475_s3 + $0x58] sm:$0xff]   ;;  %v364_v18 = vld [vmem:[%s475_s3 + $0x68] sm:$0xff]   ;;  %v30_v26 = vsub.s32 0, %v29_v25  ;;  %v34_v28 = vsub.s32 1, %v29_v25 }
   0x5   :  { %327 = vmatprep.subr.bf16.mxu1 %v356_v10  ;;  %v361_v15 = vld [vmem:[%s475_s3 + $0x18] sm:$0xff]   ;;  %v362_v16 = vld [vmem:[%s475_s3 + $0x60] sm:$0xff]   ;;  %v365_v19 = vld [vmem:[%s475_s3 + $0x28] sm:$0xff]  }
   0x6   :  { %v363_v17 = vld [vmem:[%s475_s3 + $0x20] sm:$0xff]   ;;  %v366_v20 = vld [vmem:[%s475_s3 + $0x70] sm:$0xff]   ;;  %v368_v22 = vld [vmem:[%s475_s3 + $0x78] sm:$0xff]  }
   0x7   :  { %72 = vmatpush1.bf16.msra.mxu0 %v64_v8  ;;  %v367_v21 = vld [vmem:[%s475_s3 + $0x30] sm:$0xff]   ;;  %v369_v23 = vld [vmem:[%s475_s3 + $0x38] sm:$0xff]   ;;  %v26_v27 = vld [vmem:[%s476_s2] sm:$0x3] }
   0x8   :  { %328 = vmatpush3.bf16.msra.mxu1 %v357_v11  ;;  %v31_v29 = vrot.slane %v26_v27, %v30_v26  ;;  %v35_v30 = vrot.slane %v26_v27, %v34_v28  ;;  %v308_v46 = vld [vmem:[%s477_s4] ss:$0 sm:$0xff] }
   0x9   :  { %329 = vmatprep.subr.bf16.mxu1 %v358_v12 }
   0xa   :  { %307 = vmatmul.mubr.msk.bf16.vlgmr.msra.gmra.mrb[0].mxu0 %vm58_vm1, %v353_v9 }
   0xc   :  { %330 = vmatpush3.bf16.msra.mxu1 %v359_v13 }
   0xd   :  { %331 = vmatprep.subr.bf16.mxu1 %v360_v14 }
  0x10   :  { %332 = vmatpush3.bf16.msra.mxu1 %v361_v15 }
  0x11   :  { %333 = vmatprep.subr.bf16.mxu1 %v362_v16 }
  0x14   :  { %334 = vmatpush3.bf16.msra.mxu1 %v363_v17 }
  0x15   :  { %335 = vmatprep.subr.bf16.mxu1 %v364_v18 }
  0x18   :  { %336 = vmatpush3.bf16.msra.mxu1 %v365_v19 }
  0x19   :  { %337 = vmatprep.subr.bf16.mxu1 %v366_v20 }
  0x1c   :  { %338 = vmatpush3.bf16.msra.mxu1 %v367_v21 }
  0x1d   :  { %339 = vmatprep.subr.bf16.mxu1 %v368_v22 }
  0x20   :  { %340 = vmatpush3.bf16.msra.mxu1 %v369_v23 }
  0xdd   :  { %v103_v31 = vpop.f32.mrb[0].mxu0 }
  0xde   :  { %v104_v32 = vadd.f32 %v103_v31, %v31_v29  ;;  %v105_v33 = vpop.f32.mrb[1].mxu0 }
  0xdf   :  { %v106_v34 = vadd.f32 %v105_v33, %v35_v30  ;;  %v107_v35 = vpop.f32.mrb[2].mxu0 }
  0xe0   :  { %v108_v36 = vadd.f32 %v107_v35, %v31_v29  ;;  %v109_v37 = vpop.f32.mrb[3].mxu0  ;;  %v112_v39 = vmax.f32 %v104_v32, 0.0 }
  0xe1   :  { %v110_v38 = vadd.f32 %v109_v37, %v35_v30  ;;  %v113_v41 = vmax.f32 %v106_v34, 0.0 }
  0xe2   :  { %v114_v40 = vmax.f32 %v108_v36, 0.0 }
  0xe3   :  { %v115_v42 = vmax.f32 %v110_v38, 0.0 }
  0xe4   :  { %v116_v43 = vpack.c.bf16 %v114_v40, %v112_v39 }
  0xe5   :  { %v117_v44 = vpack.c.bf16 %v115_v42, %v113_v41 }
  0xe7   :  { %285 = vmatprep.mubr.bf16.mxu1 %v117_v44 }
  0xe8   :  { %286 = vmatmul.mubr.bf16.vlgmr.msra.gmra.mrb[0].mxu1 %v116_v43 }
 0x1bb   :  { %v341_v45 = vpop.f32.mrb[0].mxu1 }
 0x1bc   :  { %v342_v47 = vpop.f32.mrb[1].mxu1 }
 0x1bd   :  { %v343_v48 = vadd.f32 %v342_v47, %v341_v45  ;;  %v344_v49 = vpop.f32.mrb[2].mxu1 }
 0x1be   :  { %v345_v50 = vpop.f32.mrb[3].mxu1 }
 0x1bf   :  { %v288_v51 = vadd.f32 %v343_v48, %v308_v46  ;;  %v346_v52 = vadd.f32 %v345_v50, %v344_v49 }
 0x1c1   :  { %295 = vst.msk [vmem:[%s478_s5] sm:$0xff] %vm294_vm2, %v288_v51  ;;  %v291_v53 = vadd.f32 %v346_v52, %v308_v46 }
 0x1c3   :  { %296 = vst.msk [vmem:[%s478_s5 + $0x8] sm:$0xff] %vm294_vm2, %v291_v53 }

</bundles_post_ra>
